<compile_context>
chip_gen: v7x
topology: tpu7x:2x2x1
jax: 0.10.0
libtpu: 0.0.40
codegen_flags: <defaults>
</compile_context>

<pallas_src>
import functools

import jax
import jax.numpy as jnp
from jax.experimental import pallas as pl
from jax.experimental.pallas import tpu as pltpu


def _round_up(x, m):
    return ((x + m - 1) // m) * m


# ----------------------------------------------------------------------------
# Host-side: bilinear resize weight matrix (align_corners=False), built in f32.
# ----------------------------------------------------------------------------
def bilinear_matrix(src_size: int, dst_size: int):
    scale = src_size / dst_size
    dst = jnp.arange(dst_size, dtype=jnp.float32)
    src = (dst + 0.5) * scale - 0.5
    x0 = jnp.floor(src)
    frac = src - x0
    x0i = x0.astype(jnp.int32)
    lo = jnp.clip(x0i, 0, src_size - 1)
    hi = jnp.clip(x0i + 1, 0, src_size - 1)
    rows = jnp.arange(dst_size)
    m = jnp.zeros((dst_size, src_size), jnp.float32)
    m = m.at[rows, lo].add(1.0 - frac)
    m = m.at[rows, hi].add(frac)
    return m                                             # (dst_size, src_size)


def _vmem_capacity_bytes():
    try:
        return int(pltpu.get_tpu_info().vmem_capacity_bytes)
    except Exception:
        return 64 << 20          # conservative (v7x-sized) fallback


# ----------------------------------------------------------------------------
# Kernel A: height-first order, grid over out_h tiles.
#   1) per-channel (tile_oh, H) @ (H, W)  -> concat into (C*tile_oh, W)
#   2) ONE folded matmul (C*tile_oh, W) @ (W, out_wp) -> single unmasked store.
# Padded weights (zero A rows / zero B cols) emit the final padded tile directly.
# ----------------------------------------------------------------------------
def _resize_hf_kernel(a_ref, b_ref, img_ref, out_ref, *, new_h):
    # a_ref:   (tile_oh, H)  bf16 height-weight tile (zero rows => bottom pad)
    # b_ref:   (W, out_wp)   bf16 width weights (zero cols => right pad), invariant
    # img_ref: (C, H, W)     bf16 full image, grid-invariant
    # out_ref: (C, tile_oh, out_wp)
    C = img_ref.shape[0]
    tile_oh = a_ref.shape[0]
    row0 = pl.program_id(0) * tile_oh

    @pl.when(row0 >= new_h)                 # whole tile is bottom pad: skip MXU work
    def _():
        out_ref[...] = jnp.zeros_like(out_ref)

    @pl.when(row0 < new_h)
    def _():
        a = a_ref[...]
        # Height resize per channel (C small & static), stacked along M.
        u = jnp.concatenate(
            [jnp.dot(a, img_ref[c], preferred_element_type=jnp.float32
                     ).astype(jnp.bfloat16) for c in range(C)],
            axis=0)                                           # (C*tile_oh, W)
        # Width resize with channels folded into M: one lane-dense MXU matmul,
        # one full unmasked store (out_wp is a multiple of 128).
        out2d = jnp.dot(u, b_ref[...], preferred_element_type=jnp.float32)
        out_ref[...] = out2d.reshape(out_ref.shape).astype(out_ref.dtype)


# ----------------------------------------------------------------------------
# Kernel B: width-first order, grid over out_w tiles.
#   1) ONE folded matmul (C*H, W) @ (W, tile_w)
#   2) per-channel (out_h, H) @ (H, tile_w) -> lane-dense stores (tile_w % 128 == 0).
# ----------------------------------------------------------------------------
def _resize_wf_kernel(a_ref, b_ref, img_ref, out_ref, *, new_w):
    # a_ref:   (out_h, H)    bf16 height weights (zero rows => bottom pad), invariant
    # b_ref:   (W, tile_w)   bf16 width-weight tile (zero cols => right pad)
    # img_ref: (C*H, W)      bf16 channel-folded image, grid-invariant
    # out_ref: (C, out_h, tile_w)
    C, out_h, tile_w = out_ref.shape
    H = a_ref.shape[1]
    col0 = pl.program_id(0) * tile_w

    @pl.when(col0 >= new_w)                 # whole tile is right pad: skip MXU work
    def _():
        out_ref[...] = jnp.zeros_like(out_ref)

    @pl.when(col0 < new_w)
    def _():
        t = jnp.dot(img_ref[...], b_ref[...], preferred_element_type=jnp.float32)
        t = t.reshape(C, H, tile_w).astype(jnp.bfloat16)
        a = a_ref[...]
        for c in range(C):
            out_ref[c] = jnp.dot(a, t[c],
                                 preferred_element_type=jnp.float32
                                 ).astype(out_ref.dtype)


# ----------------------------------------------------------------------------
# Wrapper: builds padded weights, picks contraction order/tiling, runs the call.
# ----------------------------------------------------------------------------
def resize_and_pad(img, new_h, new_w, out_h, out_w):
    C, H, W = img.shape
    out_dtype = img.dtype
    itemsize = jnp.dtype(out_dtype).itemsize

    vmem_cap = _vmem_capacity_bytes()
    # Generation-aware width-tile cap: 1024 on 128-MiB VMEM parts (v5e/v6e),
    # 512 on v7x (64 MiB).  Both are multiples of 256 (MXU N dimension).
    w_cap = 1024 if vmem_cap >= (96 << 20) else 512

    # Trace-time contraction-order choice (MACs per channel).
    flops_hf = out_h * W * (H + out_w)        # height-first
    flops_wf = H * out_w * (W + out_h)        # width-first
    height_first = flops_hf <= flops_wf

    A = bilinear_matrix(H, new_h)             # (new_h, H)  f32
    Bt = bilinear_matrix(W, new_w).T          # (W, new_w)  f32

    # Lane-dense output: pad out_w up to a multiple of 128 with zero B columns.
    out_wp = _round_up(out_w, 128)

    if height_first:
        if out_h > w_cap:
            tile_oh = 256
            out_hp = _round_up(out_h, tile_oh)
        else:
            out_hp = _round_up(out_h, 16)     # keeps bf16 sublane packing aligned
            tile_oh = out_hp
        grid = (out_hp // tile_oh,)

        Af = jnp.zeros((out_hp, H), jnp.float32).at[:new_h].set(A).astype(jnp.bfloat16)
        Bf = jnp.zeros((W, out_wp), jnp.float32).at[:, :new_w].set(Bt).astype(jnp.bfloat16)
        imgk = img.astype(jnp.bfloat16)                 # cast hoisted: 1/2 image DMA

        kernel = functools.partial(_resize_hf_kernel, new_h=new_h)

        # A tile varies with the grid; redirect fully-pad tiles to block 0 so no
        # distinct (all-zero) weight tile is DMA'd for them.
        a_spec = dict(block_shape=(tile_oh, H),
                      index_map=lambda j: (jnp.where(j * tile_oh < new_h, j, 0), 0))
        b_spec = dict(block_shape=(W, out_wp), index_map=lambda j: (0, 0))
        img_spec = dict(block_shape=(C, H, W), index_map=lambda j: (0, 0, 0))
        out_spec = pl.BlockSpec((C, tile_oh, out_wp), lambda j: (0, j, 0))
        out_shape = jax.ShapeDtypeStruct((C, out_hp, out_wp), out_dtype)
        invariant = (False, True, True)       # (A, B, img) grid-invariance

        est = (2 * (C * H * W * 2 + W * out_wp * 2 + tile_oh * H * 2
                    + C * tile_oh * out_wp * itemsize)
               + 8 * C * tile_oh * W          # u (f32 result + bf16 copy + concat)
               + 8 * C * tile_oh * out_wp)    # out2d f32 + cast copy
    else:
        if out_wp > w_cap:
            tile_w = w_cap
            out_wp = _round_up(out_wp, tile_w)
        else:
            tile_w = out_wp
        grid = (out_wp // tile_w,)

        Af = jnp.zeros((out_h, H), jnp.float32).at[:new_h].set(A).astype(jnp.bfloat16)
        Bf = jnp.zeros((W, out_wp), jnp.float32).at[:, :new_w].set(Bt).astype(jnp.bfloat16)
        imgk = img.reshape(C * H, W).astype(jnp.bfloat16)   # fold + cast hoisted

        kernel = functools.partial(_resize_wf_kernel, new_w=new_w)

        a_spec = dict(block_shape=(out_h, H), index_map=lambda j: (0, 0))
        b_spec = dict(block_shape=(W, tile_w),
                      index_map=lambda j: (0, jnp.where(j * tile_w < new_w, j, 0)))
        img_spec = dict(block_shape=(C * H, W), index_map=lambda j: (0, 0))
        out_spec = pl.BlockSpec((C, out_h, tile_w), lambda j: (0, 0, j))
        out_shape = jax.ShapeDtypeStruct((C, out_h, out_wp), out_dtype)
        invariant = (True, False, True)

        est = (2 * (C * H * W * 2 + out_h * H * 2 + W * tile_w * 2
                    + C * out_h * tile_w * itemsize)
               + 6 * C * H * tile_w           # t f32 + bf16 copy
               + 8 * C * out_h * tile_w)      # per-channel f32 results + casts

    # Generation-aware VMEM ceiling: 85% of physical, never the old hard 64 MiB.
    vmem_limit = int(min(max(est + (8 << 20), 32 << 20), int(0.85 * vmem_cap)))

    def _call(single_buffer):
        def mk(spec, inv):
            if inv and single_buffer:
                # Grid-invariant operand: single-buffer it (halves its VMEM).
                return pl.BlockSpec(spec["block_shape"], spec["index_map"],
                                    pipeline_mode=pl.Buffered(1))
            return pl.BlockSpec(spec["block_shape"], spec["index_map"])

        return pl.pallas_call(
            kernel,
            out_shape=out_shape,
            grid=grid,
            in_specs=[mk(a_spec, invariant[0]),
                      mk(b_spec, invariant[1]),
                      mk(img_spec, invariant[2])],
            out_specs=out_spec,
            compiler_params=pltpu.CompilerParams(
                # "arbitrary": a megacore "parallel" split over this axis would
                # duplicate the grid-invariant image HBM reads on v7x.
                dimension_semantics=("arbitrary",),
                vmem_limit_bytes=vmem_limit,
            ),
        )(Af, Bf, imgk)

    try:
        out = _call(single_buffer=True)
        jax.block_until_ready(out)
    except Exception:
        # Fallback for jax versions that reject pl.Buffered(1): identical result,
        # just default double-buffered resident operands.
        out = _call(single_buffer=False)

    # Strip the lane/alignment padding (the semantic zero pad stays).
    return out[:, :out_h, :out_w]


# ----------------------------------------------------------------------------
# Wrapper reproducing Resize.forward semantics on a dict sample.
# ----------------------------------------------------------------------------
def resize_forward(sample, output_shape, rand01):
    new_shape = int((0.7 + 0.3 * rand01) * output_shape)
    img = sample["img"]
    C, H, W = img.shape
    if H > W:
        new_h, new_w = int(new_shape * H / W), new_shape
    else:
        new_h, new_w = new_shape, int(new_shape * W / H)

    pad = max(output_shape - new_shape, 0)
    out_h, out_w = new_h + pad, new_w + pad

    out = dict(sample)
    out["img"] = resize_and_pad(img, new_h, new_w, out_h, out_w)

    # Landmark scaling: tiny arrays -> plain JAX (no pallas_call launch cost).
    sx, sy = new_w / W, new_h / H
    out["ldmks2D"] = sample["ldmks2D"] * jnp.asarray([sx, sy],
                                                     sample["ldmks2D"].dtype)
    out["ldmks3D"] = sample["ldmks3D"] * jnp.asarray([sx, sy, 1.0],
                                                     sample["ldmks3D"].dtype)
    return out


if __name__ == "__main__":
    key = jax.random.PRNGKey(0)
    k_img, k_img2, k_l2, k_l3, k_rand = jax.random.split(key, 5)

    output_shape = 16
    N_LDMK = 8

    # Deterministic stand-in for np.random.rand(1)[0] (shapes must be static).
    rand01 = float(jax.random.uniform(k_rand, ()))
    new_shape = int((0.7 + 0.3 * rand01) * output_shape)

    # ---------------- Sample A: square image (height-first kernel) ----------
    C, H, W = 4, 16, 16
    sample_a = {
        "img": jax.random.normal(k_img, (C, H, W), jnp.float32),
        "ldmks2D": jax.random.uniform(k_l2, (N_LDMK, 2), jnp.float32) * W,
        "ldmks3D": jax.random.uniform(k_l3, (N_LDMK, 3), jnp.float32) * W,
    }
    out_a = resize_forward(sample_a, output_shape, rand01)
    jax.block_until_ready(out_a["img"])
    jax.block_until_ready(out_a["ldmks2D"])
    jax.block_until_ready(out_a["ldmks3D"])

    assert out_a["img"].shape == (C, output_shape, output_shape)
    assert out_a["ldmks2D"].shape == (N_LDMK, 2)
    assert out_a["ldmks3D"].shape == (N_LDMK, 3)
    assert bool(jnp.all(out_a["img"][:, new_shape:, :] == 0))
    assert bool(jnp.all(out_a["img"][:, :, new_shape:] == 0))
    A_ref = bilinear_matrix(H, new_shape)
    B_ref = bilinear_matrix(W, new_shape)
    expect_a = jnp.einsum("nh,chw,mw->cnm", A_ref, sample_a["img"], B_ref)
    err_a = float(jnp.max(jnp.abs(out_a["img"][:, :new_shape, :new_shape] - expect_a)))
    assert err_a < 5e-2, f"square max abs err {err_a}"

    # ---------------- Sample B: landscape image (width-first kernel) --------
    C2, H2, W2 = 3, 16, 32
    sample_b = {
        "img": jax.random.normal(k_img2, (C2, H2, W2), jnp.float32),
        "ldmks2D": sample_a["ldmks2D"],
        "ldmks3D": sample_a["ldmks3D"],
    }
    out_b = resize_forward(sample_b, output_shape, rand01)
    jax.block_until_ready(out_b["img"])

    new_h2, new_w2 = new_shape, int(new_shape * W2 / H2)
    pad2 = output_shape - new_shape
    assert out_b["img"].shape == (C2, new_h2 + pad2, new_w2 + pad2)
    assert bool(jnp.all(out_b["img"][:, new_h2:, :] == 0))
    assert bool(jnp.all(out_b["img"][:, :, new_w2:] == 0))
    A2 = bilinear_matrix(H2, new_h2)
    B2 = bilinear_matrix(W2, new_w2)
    expect_b = jnp.einsum("nh,chw,mw->cnm", A2, sample_b["img"], B2)
    err_b = float(jnp.max(jnp.abs(out_b["img"][:, :new_h2, :new_w2] - expect_b)))
    assert err_b < 5e-2, f"landscape max abs err {err_b}"

    print("KERNEL_OK")
</pallas_src>

<mosaic_0001>
module attributes {stable_mosaic.version = 11 : i64} {
  func.func @_resize_hf_kernel(%arg0: i32, %arg1: memref<16x16xbf16, #tpu.memory_space<vmem>>, %arg2: memref<16x128xbf16, #tpu.memory_space<vmem>>, %arg3: memref<4x16x16xbf16, #tpu.memory_space<vmem>>, %arg4: memref<4x16x128xf32, #tpu.memory_space<vmem>>) attributes {dimension_semantics = [#tpu.dimension_semantics<arbitrary>], iteration_bounds = array<i64: 1>, scalar_prefetch = 0 : i64, scratch_operands = 0 : i64, tpu.core_type = #tpu.core_type<tc>, window_params = [{transform_indices = @transform_0, window_bounds = array<i64: 16, 16>}, {pipeline_mode = #tpu.pipeline_mode<synchronous>, transform_indices = @transform_1, window_bounds = array<i64: 16, 128>}, {pipeline_mode = #tpu.pipeline_mode<synchronous>, transform_indices = @transform_2, window_bounds = array<i64: 4, 16, 16>}, {transform_indices = @transform_3, window_bounds = array<i64: 4, 16, 128>}]} {
    %c16_i32 = arith.constant 16 : i32
    %0 = arith.muli %arg0, %c16_i32 : i32
    %c11_i32 = arith.constant 11 : i32
    %1 = arith.cmpi sge, %0, %c11_i32 : i32
    %2 = arith.extui %1 : i1 to i32
    %c0_i32 = arith.constant 0 : i32
    %3 = arith.cmpi ne, %2, %c0_i32 : i32
    scf.if %3 {
      %cst = arith.constant 0.000000e+00 : f32
      %7 = vector.broadcast %cst : f32 to vector<4x16x128xf32>
      %c0 = arith.constant 0 : index
      %c0_2 = arith.constant 0 : index
      %c0_3 = arith.constant 0 : index
      %8 = vector.load %arg4[%c0, %c0_2, %c0_3] : memref<4x16x128xf32, #tpu.memory_space<vmem>>, vector<4x16x128xf32>
      tpu.vector_store %arg4[%c0, %c0_2, %c0_3], %7 {strides = array<i32>} : memref<4x16x128xf32, #tpu.memory_space<vmem>>, vector<4x16x128xf32>,
    } else {
    }
    %c11_i32_0 = arith.constant 11 : i32
    %4 = arith.cmpi slt, %0, %c11_i32_0 : i32
    %5 = arith.extui %4 : i1 to i32
    %c0_i32_1 = arith.constant 0 : i32
    %6 = arith.cmpi ne, %5, %c0_i32_1 : i32
    scf.if %6 {
      %c0 = arith.constant 0 : index
      %c0_2 = arith.constant 0 : index
      %7 = vector.load %arg1[%c0, %c0_2] : memref<16x16xbf16, #tpu.memory_space<vmem>>, vector<16x16xbf16>
      %c0_3 = arith.constant 0 : index
      %c0_4 = arith.constant 0 : index
      %c0_5 = arith.constant 0 : index
      %8 = vector.load %arg3[%c0_3, %c0_4, %c0_5] : memref<4x16x16xbf16, #tpu.memory_space<vmem>>, vector<1x16x16xbf16>
      %9 = vector.shape_cast %8 : vector<1x16x16xbf16> to vector<16x16xbf16>
      %cst = arith.constant dense<0.000000e+00> : vector<16x16xf32>
      %10 = tpu.matmul %7, %9, %cst {dimension_numbers = #tpu.dot_dimension_numbers<[1], [0], [0], [1], [0, 0, 1, 1], [], []>} : vector<16x16xbf16>, vector<16x16xbf16>, vector<16x16xf32> -> vector<16x16xf32>
      %11 = arith.truncf %10 : vector<16x16xf32> to vector<16x16xbf16>
      %c1 = arith.constant 1 : index
      %c0_6 = arith.constant 0 : index
      %c0_7 = arith.constant 0 : index
      %12 = vector.load %arg3[%c1, %c0_6, %c0_7] : memref<4x16x16xbf16, #tpu.memory_space<vmem>>, vector<1x16x16xbf16>
      %13 = vector.shape_cast %12 : vector<1x16x16xbf16> to vector<16x16xbf16>
      %cst_8 = arith.constant dense<0.000000e+00> : vector<16x16xf32>
      %14 = tpu.matmul %7, %13, %cst_8 {dimension_numbers = #tpu.dot_dimension_numbers<[1], [0], [0], [1], [0, 0, 1, 1], [], []>} : vector<16x16xbf16>, vector<16x16xbf16>, vector<16x16xf32> -> vector<16x16xf32>
      %15 = arith.truncf %14 : vector<16x16xf32> to vector<16x16xbf16>
      %c2 = arith.constant 2 : index
      %c0_9 = arith.constant 0 : index
      %c0_10 = arith.constant 0 : index
      %16 = vector.load %arg3[%c2, %c0_9, %c0_10] : memref<4x16x16xbf16, #tpu.memory_space<vmem>>, vector<1x16x16xbf16>
      %17 = vector.shape_cast %16 : vector<1x16x16xbf16> to vector<16x16xbf16>
      %cst_11 = arith.constant dense<0.000000e+00> : vector<16x16xf32>
      %18 = tpu.matmul %7, %17, %cst_11 {dimension_numbers = #tpu.dot_dimension_numbers<[1], [0], [0], [1], [0, 0, 1, 1], [], []>} : vector<16x16xbf16>, vector<16x16xbf16>, vector<16x16xf32> -> vector<16x16xf32>
      %19 = arith.truncf %18 : vector<16x16xf32> to vector<16x16xbf16>
      %c3 = arith.constant 3 : index
      %c0_12 = arith.constant 0 : index
      %c0_13 = arith.constant 0 : index
      %20 = vector.load %arg3[%c3, %c0_12, %c0_13] : memref<4x16x16xbf16, #tpu.memory_space<vmem>>, vector<1x16x16xbf16>
      %21 = vector.shape_cast %20 : vector<1x16x16xbf16> to vector<16x16xbf16>
      %cst_14 = arith.constant dense<0.000000e+00> : vector<16x16xf32>
      %22 = tpu.matmul %7, %21, %cst_14 {dimension_numbers = #tpu.dot_dimension_numbers<[1], [0], [0], [1], [0, 0, 1, 1], [], []>} : vector<16x16xbf16>, vector<16x16xbf16>, vector<16x16xf32> -> vector<16x16xf32>
      %23 = arith.truncf %22 : vector<16x16xf32> to vector<16x16xbf16>
      %24 = tpu.concatenate %11, %15, %19, %23 in 0 : vector<16x16xbf16>, vector<16x16xbf16>, vector<16x16xbf16>, vector<16x16xbf16> -> vector<64x16xbf16>
      %c0_15 = arith.constant 0 : index
      %c0_16 = arith.constant 0 : index
      %25 = vector.load %arg2[%c0_15, %c0_16] : memref<16x128xbf16, #tpu.memory_space<vmem>>, vector<16x128xbf16>
      %cst_17 = arith.constant dense<0.000000e+00> : vector<64x128xf32>
      %26 = tpu.matmul %24, %25, %cst_17 {dimension_numbers = #tpu.dot_dimension_numbers<[1], [0], [0], [1], [0, 0, 1, 1], [], []>} : vector<64x16xbf16>, vector<16x128xbf16>, vector<64x128xf32> -> vector<64x128xf32>
      %27 = vector.shape_cast %26 : vector<64x128xf32> to vector<4x16x128xf32>
      %c0_18 = arith.constant 0 : index
      %c0_19 = arith.constant 0 : index
      %c0_20 = arith.constant 0 : index
      %28 = vector.load %arg4[%c0_18, %c0_19, %c0_20] : memref<4x16x128xf32, #tpu.memory_space<vmem>>, vector<4x16x128xf32>
      tpu.vector_store %arg4[%c0_18, %c0_19, %c0_20], %27 {strides = array<i32>} : memref<4x16x128xf32, #tpu.memory_space<vmem>>, vector<4x16x128xf32>,
    } else {
    }
    return
  }
  func.func @transform_0(%arg0: i32) -> (i32, i32) {
    %c16_i32 = arith.constant 16 : i32
    %0 = arith.muli %arg0, %c16_i32 : i32
    %c11_i32 = arith.constant 11 : i32
    %1 = arith.cmpi slt, %0, %c11_i32 : i32
    %c0_i32 = arith.constant 0 : i32
    %2 = arith.select %1, %arg0, %c0_i32 : i32
    %c0_i32_0 = arith.constant 0 : i32
    %c0_i32_1 = arith.constant 0 : i32
    return %2, %c0_i32_0 : i32, i32
  }
  func.func @transform_1(%arg0: i32) -> (i32, i32) {
    %c0_i32 = arith.constant 0 : i32
    %c0_i32_0 = arith.constant 0 : i32
    %c0_i32_1 = arith.constant 0 : i32
    return %c0_i32, %c0_i32_0 : i32, i32
  }
  func.func @transform_2(%arg0: i32) -> (i32, i32, i32) {
    %c0_i32 = arith.constant 0 : i32
    %c0_i32_0 = arith.constant 0 : i32
    %c0_i32_1 = arith.constant 0 : i32
    %c0_i32_2 = arith.constant 0 : i32
    return %c0_i32, %c0_i32_0, %c0_i32_1 : i32, i32, i32
  }
  func.func @transform_3(%arg0: i32) -> (i32, i32, i32) {
    %c0_i32 = arith.constant 0 : i32
    %c0_i32_0 = arith.constant 0 : i32
    %c0_i32_1 = arith.constant 0 : i32
    return %c0_i32, %arg0, %c0_i32_0 : i32, i32, i32
  }
}

module attributes {stable_mosaic.version = 11 : i64} {
  func.func @_resize_hf_kernel(%arg0: i32, %arg1: memref<16x16xbf16, #tpu.memory_space<vmem>>, %arg2: memref<16x128xbf16, #tpu.memory_space<vmem>>, %arg3: memref<4x16x16xbf16, #tpu.memory_space<vmem>>, %arg4: memref<4x16x128xf32, #tpu.memory_space<vmem>>) attributes {dimension_semantics = [#tpu.dimension_semantics<arbitrary>], iteration_bounds = array<i64: 1>, scalar_prefetch = 0 : i64, scratch_operands = 0 : i64, tpu.core_type = #tpu.core_type<tc>, window_params = [{transform_indices = @transform_0, window_bounds = array<i64: 16, 16>}, {pipeline_mode = #tpu.pipeline_mode<synchronous>, transform_indices = @transform_1, window_bounds = array<i64: 16, 128>}, {pipeline_mode = #tpu.pipeline_mode<synchronous>, transform_indices = @transform_2, window_bounds = array<i64: 4, 16, 16>}, {transform_indices = @transform_3, window_bounds = array<i64: 4, 16, 128>}]} {
    %c16_i32 = arith.constant 16 : i32
    %0 = arith.muli %arg0, %c16_i32 : i32
    %c11_i32 = arith.constant 11 : i32
    %1 = arith.cmpi sge, %0, %c11_i32 : i32
    %2 = arith.extui %1 : i1 to i32
    %c0_i32 = arith.constant 0 : i32
    %3 = arith.cmpi ne, %2, %c0_i32 : i32
    scf.if %3 {
      %cst = arith.constant 0.000000e+00 : f32
      %7 = vector.broadcast %cst : f32 to vector<4x16x128xf32>
      %c0 = arith.constant 0 : index
      %c0_2 = arith.constant 0 : index
      %c0_3 = arith.constant 0 : index
      %8 = vector.load %arg4[%c0, %c0_2, %c0_3] : memref<4x16x128xf32, #tpu.memory_space<vmem>>, vector<4x16x128xf32>
      tpu.vector_store %arg4[%c0, %c0_2, %c0_3], %7 {strides = array<i32>} : memref<4x16x128xf32, #tpu.memory_space<vmem>>, vector<4x16x128xf32>,
    } else {
    }
    %c11_i32_0 = arith.constant 11 : i32
    %4 = arith.cmpi slt, %0, %c11_i32_0 : i32
    %5 = arith.extui %4 : i1 to i32
    %c0_i32_1 = arith.constant 0 : i32
    %6 = arith.cmpi ne, %5, %c0_i32_1 : i32
    scf.if %6 {
      %c0 = arith.constant 0 : index
      %c0_2 = arith.constant 0 : index
      %7 = vector.load %arg1[%c0, %c0_2] : memref<16x16xbf16, #tpu.memory_space<vmem>>, vector<16x16xbf16>
      %c0_3 = arith.constant 0 : index
      %c0_4 = arith.constant 0 : index
      %c0_5 = arith.constant 0 : index
      %8 = vector.load %arg3[%c0_3, %c0_4, %c0_5] : memref<4x16x16xbf16, #tpu.memory_space<vmem>>, vector<1x16x16xbf16>
      %9 = vector.shape_cast %8 : vector<1x16x16xbf16> to vector<16x16xbf16>
      %cst = arith.constant dense<0.000000e+00> : vector<16x16xf32>
      %10 = tpu.matmul %7, %9, %cst {dimension_numbers = #tpu.dot_dimension_numbers<[1], [0], [0], [1], [0, 0, 1, 1], [], []>} : vector<16x16xbf16>, vector<16x16xbf16>, vector<16x16xf32> -> vector<16x16xf32>
      %11 = arith.truncf %10 : vector<16x16xf32> to vector<16x16xbf16>
      %c1 = arith.constant 1 : index
      %c0_6 = arith.constant 0 : index
      %c0_7 = arith.constant 0 : index
      %12 = vector.load %arg3[%c1, %c0_6, %c0_7] : memref<4x16x16xbf16, #tpu.memory_space<vmem>>, vector<1x16x16xbf16>
      %13 = vector.shape_cast %12 : vector<1x16x16xbf16> to vector<16x16xbf16>
      %cst_8 = arith.constant dense<0.000000e+00> : vector<16x16xf32>
      %14 = tpu.matmul %7, %13, %cst_8 {dimension_numbers = #tpu.dot_dimension_numbers<[1], [0], [0], [1], [0, 0, 1, 1], [], []>} : vector<16x16xbf16>, vector<16x16xbf16>, vector<16x16xf32> -> vector<16x16xf32>
      %15 = arith.truncf %14 : vector<16x16xf32> to vector<16x16xbf16>
      %c2 = arith.constant 2 : index
      %c0_9 = arith.constant 0 : index
      %c0_10 = arith.constant 0 : index
      %16 = vector.load %arg3[%c2, %c0_9, %c0_10] : memref<4x16x16xbf16, #tpu.memory_space<vmem>>, vector<1x16x16xbf16>
      %17 = vector.shape_cast %16 : vector<1x16x16xbf16> to vector<16x16xbf16>
      %cst_11 = arith.constant dense<0.000000e+00> : vector<16x16xf32>
      %18 = tpu.matmul %7, %17, %cst_11 {dimension_numbers = #tpu.dot_dimension_numbers<[1], [0], [0], [1], [0, 0, 1, 1], [], []>} : vector<16x16xbf16>, vector<16x16xbf16>, vector<16x16xf32> -> vector<16x16xf32>
      %19 = arith.truncf %18 : vector<16x16xf32> to vector<16x16xbf16>
      %c3 = arith.constant 3 : index
      %c0_12 = arith.constant 0 : index
      %c0_13 = arith.constant 0 : index
      %20 = vector.load %arg3[%c3, %c0_12, %c0_13] : memref<4x16x16xbf16, #tpu.memory_space<vmem>>, vector<1x16x16xbf16>
      %21 = vector.shape_cast %20 : vector<1x16x16xbf16> to vector<16x16xbf16>
      %cst_14 = arith.constant dense<0.000000e+00> : vector<16x16xf32>
      %22 = tpu.matmul %7, %21, %cst_14 {dimension_numbers = #tpu.dot_dimension_numbers<[1], [0], [0], [1], [0, 0, 1, 1], [], []>} : vector<16x16xbf16>, vector<16x16xbf16>, vector<16x16xf32> -> vector<16x16xf32>
      %23 = arith.truncf %22 : vector<16x16xf32> to vector<16x16xbf16>
      %24 = tpu.concatenate %11, %15, %19, %23 in 0 : vector<16x16xbf16>, vector<16x16xbf16>, vector<16x16xbf16>, vector<16x16xbf16> -> vector<64x16xbf16>
      %c0_15 = arith.constant 0 : index
      %c0_16 = arith.constant 0 : index
      %25 = vector.load %arg2[%c0_15, %c0_16] : memref<16x128xbf16, #tpu.memory_space<vmem>>, vector<16x128xbf16>
      %cst_17 = arith.constant dense<0.000000e+00> : vector<64x128xf32>
      %26 = tpu.matmul %24, %25, %cst_17 {dimension_numbers = #tpu.dot_dimension_numbers<[1], [0], [0], [1], [0, 0, 1, 1], [], []>} : vector<64x16xbf16>, vector<16x128xbf16>, vector<64x128xf32> -> vector<64x128xf32>
      %27 = vector.shape_cast %26 : vector<64x128xf32> to vector<4x16x128xf32>
      %c0_18 = arith.constant 0 : index
      %c0_19 = arith.constant 0 : index
      %c0_20 = arith.constant 0 : index
      %28 = vector.load %arg4[%c0_18, %c0_19, %c0_20] : memref<4x16x128xf32, #tpu.memory_space<vmem>>, vector<4x16x128xf32>
      tpu.vector_store %arg4[%c0_18, %c0_19, %c0_20], %27 {strides = array<i32>} : memref<4x16x128xf32, #tpu.memory_space<vmem>>, vector<4x16x128xf32>,
    } else {
    }
    return
  }
  func.func @transform_0(%arg0: i32) -> (i32, i32) {
    %c16_i32 = arith.constant 16 : i32
    %0 = arith.muli %arg0, %c16_i32 : i32
    %c11_i32 = arith.constant 11 : i32
    %1 = arith.cmpi slt, %0, %c11_i32 : i32
    %c0_i32 = arith.constant 0 : i32
    %2 = arith.select %1, %arg0, %c0_i32 : i32
    %c0_i32_0 = arith.constant 0 : i32
    %c0_i32_1 = arith.constant 0 : i32
    return %2, %c0_i32_0 : i32, i32
  }
  func.func @transform_1(%arg0: i32) -> (i32, i32) {
    %c0_i32 = arith.constant 0 : i32
    %c0_i32_0 = arith.constant 0 : i32
    %c0_i32_1 = arith.constant 0 : i32
    return %c0_i32, %c0_i32_0 : i32, i32
  }
  func.func @transform_2(%arg0: i32) -> (i32, i32, i32) {
    %c0_i32 = arith.constant 0 : i32
    %c0_i32_0 = arith.constant 0 : i32
    %c0_i32_1 = arith.constant 0 : i32
    %c0_i32_2 = arith.constant 0 : i32
    return %c0_i32, %c0_i32_0, %c0_i32_1 : i32, i32, i32
  }
  func.func @transform_3(%arg0: i32) -> (i32, i32, i32) {
    %c0_i32 = arith.constant 0 : i32
    %c0_i32_0 = arith.constant 0 : i32
    %c0_i32_1 = arith.constant 0 : i32
    return %c0_i32, %arg0, %c0_i32_0 : i32, i32, i32
  }
}

</mosaic_0001>

<bundles_post_ra>
// kernel: tpu_custom_call.1
= control target key start
LH: loop header
LB: loop body
LE: loop exit
PB: predicated region body
PF: predicated region fallthrough
CT: control target
= control target key end

     0   :  { %8 = vsyncpa [#allocation3], 0  ;;  %s688_s0 = inlined_call_operand.hbm [shape: bf16[16,16], index: 0, kind: input, shape index: {}]   ;;  %s689_s1 = inlined_call_operand.hbm [shape: bf16[16,128], index: 1, kind: input, shape index: {}]   ;;  %s690_s2 = inlined_call_operand.hbm [shape: bf16[4,16,16], index: 2, kind: input, shape index: {}]   ;;  %s691_s3 = inlined_call_operand.hbm [shape: f32[4,16,128], index: 3, kind: output, shape index: {}]  }
   0x1   :  { %9 = vsyncpa [#allocation6], 0 }
   0x2   :  { %10 = vsyncpa [#allocation4], 0  ;;  %s582_s12 = smov [#allocation5]   ;;  %s583_s14 = smov [#allocation2]  }
   0x3   :  { %s34_s13 = sshll.u32 %s582_s12, 4  ;;  %s22_s15 = sshll.u32 %s583_s14, 4  ;;  %s35_s13 = int_to_ptr.vmem [resolvable:$true] %s34_s13  ;;  %s612_s15 = int_to_ptr.vmem [resolvable:$true] %s22_s15 }
   0x4   :  { %s488_s18 = scalar_lea.hbm %s689_s1, 128 }
   0x5   :  { %p489_p0 = scmp.ne.s32.totalorder %s689_s1, %s488_s18  ;;  %p492_p1 = scmp.lt.u32.totalorder %s488_s18, %s689_s1 }
   0x7   :  { %p494_p2 = pnand %p492_p1, %p489_p0 }
   0x9   :  { %497 = shalt.err (!%p494_p2)
}
   0xa   :  { %s498_s23 = scalar_lea.vmem %s35_s13, 128  ;;  %p503_p4 = scmp.lt.s32.totalorder %s35_s13, %s35_s13 }
   0xb   :  { %p499_p3 = scmp.ne.s32.totalorder %s35_s13, %s498_s23  ;;  %p504_p5 = scmp.lt.s32.totalorder %s498_s23, %s498_s23 }
   0xd   :  { %p505_p6 = por %p504_p5, %p503_p4 }
   0xf   :  { %p506_p7 = pnand %p505_p6, %p499_p3 }
  0x11   :  { %509 = shalt.err (!%p506_p7)
}
  0x12   :  { %s584_s24 = smov 64   ;;  %s585_s25 = smov 4  }
  0x13   :  { %40 = dma.hbm_to_vmem [thread:$0]  %s689_s1, 128, %s35_s13, [#allocation6], %s584_s24, %s584_s24, %s585_s25  }
  0x14   :  { %s510_s30 = scalar_lea.hbm %s688_s0, 128 }
  0x15   :  { %p511_p8 = scmp.ne.s32.totalorder %s688_s0, %s510_s30  ;;  %p514_p9 = scmp.lt.u32.totalorder %s510_s30, %s688_s0 }
  0x17   :  { %p516_p10 = pnand %p514_p9, %p511_p8 }
  0x19   :  { %519 = shalt.err (!%p516_p10)
}
  0x1a   :  { %s520_s8 = scalar_lea.vmem %s612_s15, 128  ;;  %p525_p12 = scmp.lt.s32.totalorder %s612_s15, %s612_s15 }
  0x1b   :  { %p521_p11 = scmp.ne.s32.totalorder %s612_s15, %s520_s8  ;;  %p526_p13 = scmp.lt.s32.totalorder %s520_s8, %s520_s8 }
  0x1d   :  { %p527_p0 = por %p526_p13, %p525_p12 }
  0x1f   :  { %p528_p1 = pnand %p527_p0, %p521_p11 }
  0x21   :  { %531 = shalt.err (!%p528_p1)
}
  0x22   :  { %28 = dma.hbm_to_vmem [thread:$0]  %s688_s0, 128, %s612_s15, [#allocation3], %s584_s24, %s584_s24, %s585_s25  }
  0x23   :  { %s586_s10 = smov [#allocation7]   ;;  %s532_s14 = scalar_lea.hbm %s690_s2, 512 }
  0x24   :  { %s46_s11 = sshll.u32 %s586_s10, 4  ;;  %p533_p2 = scmp.ne.s32.totalorder %s690_s2, %s532_s14  ;;  %s47_s11 = int_to_ptr.vmem [resolvable:$true] %s46_s11 }
  0x25   :  { %p536_p3 = scmp.lt.u32.totalorder %s532_s14, %s690_s2 }
  0x27   :  { %p538_p4 = pnand %p536_p3, %p533_p2 }
  0x29   :  { %541 = shalt.err (!%p538_p4)
}
  0x2a   :  { %s542_s20 = scalar_lea.vmem %s47_s11, 512  ;;  %p547_p6 = scmp.lt.s32.totalorder %s47_s11, %s47_s11 }
  0x2b   :  { %p543_p5 = scmp.ne.s32.totalorder %s47_s11, %s542_s20  ;;  %p548_p7 = scmp.lt.s32.totalorder %s542_s20, %s542_s20 }
  0x2d   :  { %p549_p8 = por %p548_p7, %p547_p6 }
  0x2f   :  { %p550_p9 = pnand %p549_p8, %p543_p5 }
  0x31   :  { %553 = shalt.err (!%p550_p9)
}
  0x32   :  { %52 = dma.hbm_to_vmem [thread:$0]  %s690_s2, 512, %s47_s11, [#allocation6], %s584_s24, %s584_s24, %s585_s25  }
  0x33   :  { %576 = dma.done.wait [#allocation3], 128  }
  0x34   :  { %577 = vsyncadd [#allocation3], 4294967168 }
  0x35   :  { %578 = dma.done.wait [#allocation6], 640  }
  0x36   :  { %579 = vsyncadd [#allocation6], 4294966656  ;;  %v587_v0 = vmov 0.0   ;;  %vm588_vm0 = vmmov 0   ;;  %v482_v1 = vld [vmem:[#allocation7] sm:$0xff]   ;;  %v483_v2 = vld [vmem:[#allocation2] sm:$0xff]  }
  0x37   :  { %438 = vmatprep.subr.bf16.mxu1 %v587_v0  ;;  %440 = vmatprep.mubr.msk.bf16.mxu1 %vm588_vm0, %v587_v0  ;;  %vm99_vm1 = vcmask 130048   ;;  %v484_v3 = vld [vmem:[#allocation7 + $0x8] sm:$0xff]   ;;  %v486_v4 = vld [vmem:[#allocation7 + $0x10] sm:$0xff]   ;;  %v485_v5 = vld [vmem:[#allocation7 + $0x18] sm:$0xff]   ;;  %s589_s2 = smov [#allocation8]  }
  0x38   :  { %450 = vmatprep.subr.bf16.mxu0 %v587_v0  ;;  %452 = vmatprep.mubr.msk.bf16.mxu0 %vm588_vm0, %v587_v0  ;;  %v487_v6 = vld [vmem:[#allocation5] sm:$0xff]   ;;  %s396_s21 = sshll.u32 %s589_s2, 4  ;;  %s397_s21 = int_to_ptr.vmem [resolvable:$true] %s396_s21 }
  0x39   :  { %439 = vmatpush3.bf16.msra.mxu1 %v482_v1  ;;  %451 = vmatpush3.bf16.msra.mxu0 %v486_v4  ;;  %s554_s22 = scalar_lea.vmem %s397_s21, 1024  ;;  %p559_p11 = scmp.lt.s32.totalorder %s397_s21, %s397_s21 }
  0x3a   :  { %444 = vmatprep.subr.bf16.mxu1 %v587_v0  ;;  %462 = vmatprep.subr.bf16.mxu0 %v487_v6  ;;  %p555_p10 = scmp.ne.s32.totalorder %s397_s21, %s554_s22  ;;  %p560_p12 = scmp.lt.s32.totalorder %s554_s22, %s554_s22 }
  0x3c   :  { %441 = vmatmul.mubr.msk.bf16.vlgmr.msra.gmra.mrb[0].mxu1 %vm99_vm1, %v483_v2  ;;  %453 = vmatmul.mubr.msk.bf16.vlgmr.msra.gmra.mrb[0].mxu0 %vm99_vm1, %v483_v2  ;;  %p561_p13 = por %p560_p12, %p559_p11 }
  0x3d   :  { %445 = vmatpush3.bf16.msra.mxu1 %v484_v3  ;;  %446 = vmatprep.mubr.msk.bf16.mxu1 %vm588_vm0, %v587_v0 }
  0x3e   :  { %456 = vmatprep.subr.bf16.mxu1 %v587_v0  ;;  %463 = vmatpush3.bf16.msra.mxu0 %v487_v6  ;;  %p562_p0 = pnand %p561_p13, %p555_p10 }
  0x44   :  { %447 = vmatmul.mubr.msk.bf16.vlgmr.msra.gmra.mrb[4].mxu1 %vm99_vm1, %v483_v2 }
  0x45   :  { %457 = vmatpush3.bf16.msra.mxu1 %v485_v5  ;;  %458 = vmatprep.mubr.msk.bf16.mxu1 %vm588_vm0, %v587_v0 }
  0x4c   :  { %459 = vmatmul.mubr.msk.bf16.vlgmr.msra.gmra.mrb[8].mxu1 %vm99_vm1, %v483_v2 }
 0x10f   :  { %v137_v7 = vpop.f32.mrb[0].mxu1  ;;  %v239_v12 = vpop.f32.mrb[0].mxu0 }
 0x110   :  { %v442_v8 = vpop.f32.mrb[1].mxu1  ;;  %v454_v13 = vpop.f32.mrb[1].mxu0 }
 0x111   :  { %v140_v9 = vpop.f32.mrb[2].mxu1  ;;  %v242_v14 = vpop.f32.mrb[2].mxu0 }
 0x112   :  { %v144_v10 = vpack.c.bf16 %v140_v9, %v137_v7  ;;  %v443_v11 = vpop.f32.mrb[3].mxu1  ;;  %v246_v16 = vpack.c.bf16 %v242_v14, %v239_v12  ;;  %v455_v17 = vpop.f32.mrb[3].mxu0 }
 0x114   :  { %464 = vmatprep.mubr.msk.bf16.mxu0 %vm99_vm1, %v144_v10 }
 0x117   :  { %v188_v15 = vpop.f32.mrb[4].mxu1 }
 0x118   :  { %v448_v18 = vpop.f32.mrb[5].mxu1 }
 0x119   :  { %v191_v19 = vpop.f32.mrb[6].mxu1 }
 0x11a   :  { %v195_v20 = vpack.c.bf16 %v191_v19, %v188_v15  ;;  %v449_v21 = vpop.f32.mrb[7].mxu1 }
 0x11c   :  { %465 = vmatmul.mubr.msk.bf16.vlgmr.msra.gmra.mrb[4].mxu0 %vm99_vm1, %v195_v20 }
 0x11d   :  { %468 = vmatprep.mubr.msk.bf16.mxu0 %vm99_vm1, %v246_v16 }
 0x11f   :  { %v290_v22 = vpop.f32.mrb[8].mxu1 }
 0x120   :  { %v460_v23 = vpop.f32.mrb[9].mxu1 }
 0x121   :  { %v293_v24 = vpop.f32.mrb[10].mxu1 }
 0x122   :  { %v297_v25 = vpack.c.bf16 %v293_v24, %v290_v22  ;;  %v461_v26 = vpop.f32.mrb[11].mxu1 }
 0x124   :  { %469 = vmatmul.mubr.msk.bf16.gmra.mrb[8].mxu0 %vm99_vm1, %v297_v25 }
 0x1ef   :  { %v466_v27 = vpop.f32.mrb[4].mxu0 }
 0x1f0   :  { %385 = vst [vmem:[#allocation8 + $0x10] sm:$0xff] %v466_v27  ;;  %v352_v28 = vpop.f32.mrb[5].mxu0 }
 0x1f1   :  { %383 = vst [vmem:[#allocation8] sm:$0xff] %v352_v28  ;;  %v467_v29 = vpop.f32.mrb[6].mxu0 }
 0x1f2   :  { %386 = vst [vmem:[#allocation8 + $0x18] sm:$0xff] %v467_v29  ;;  %v355_v30 = vpop.f32.mrb[7].mxu0 }
 0x1f3   :  { %384 = vst [vmem:[#allocation8 + $0x8] sm:$0xff] %v355_v30 }
 0x1f7   :  { %v470_v31 = vpop.f32.mrb[8].mxu0 }
 0x1f8   :  { %389 = vst [vmem:[#allocation8 + $0x30] sm:$0xff] %v470_v31  ;;  %v368_v32 = vpop.f32.mrb[9].mxu0 }
 0x1f9   :  { %387 = vst [vmem:[#allocation8 + $0x20] sm:$0xff] %v368_v32  ;;  %v471_v33 = vpop.f32.mrb[10].mxu0 }
 0x1fa   :  { %390 = vst [vmem:[#allocation8 + $0x38] sm:$0xff] %v471_v33  ;;  %v371_v34 = vpop.f32.mrb[11].mxu0 }
 0x1fb   :  { %388 = vst [vmem:[#allocation8 + $0x28] sm:$0xff] %v371_v34 }
 0x1fc   :  { %565 = shalt.err (!%p562_p0)
}
 0x1fd   :  { %s566_s25 = scalar_lea.hbm %s691_s3, 1024 }
 0x1fe   :  { %p567_p1 = scmp.ne.s32.totalorder %s691_s3, %s566_s25  ;;  %p570_p2 = scmp.lt.u32.totalorder %s566_s25, %s691_s3 }
 0x200   :  { %p572_p3 = pnand %p570_p2, %p567_p1 }
 0x202   :  { %575 = shalt.err (!%p572_p3)
}
 0x203   :  { %s590_s30 = smov 128   ;;  %s591_s4 = smov 8  }
 0x204   :  { %402 = dma.vmem_to_hbm [thread:$0]  %s397_s21, 1024, %s691_s3, [#allocation4], %s590_s30, %s590_s30, %s591_s4  }
 0x205   :  { %580 = dma.done.wait [#allocation4], 1024  }
 0x206   :  { %581 = vsyncadd [#allocation4], 4294966272 }
 0x207   :  { %406 = vsyncpa [#allocation3], 1 }
 0x208   :  { %407 = vsyncpa [#allocation6], 1 }
 0x209   :  { %408 = vsyncpa [#allocation4], 1 }

// kernel: tpu_custom_call.1
= control target key start
LH: loop header
LB: loop body
LE: loop exit
PB: predicated region body
PF: predicated region fallthrough
CT: control target
= control target key end

     0   :  { %8 = vsyncpa [#allocation3], 0  ;;  %s688_s0 = inlined_call_operand.hbm [shape: bf16[16,16], index: 0, kind: input, shape index: {}]   ;;  %s689_s1 = inlined_call_operand.hbm [shape: bf16[16,128], index: 1, kind: input, shape index: {}]   ;;  %s690_s2 = inlined_call_operand.hbm [shape: bf16[4,16,16], index: 2, kind: input, shape index: {}]   ;;  %s691_s3 = inlined_call_operand.hbm [shape: f32[4,16,128], index: 3, kind: output, shape index: {}]  }
   0x1   :  { %9 = vsyncpa [#allocation6], 0 }
   0x2   :  { %10 = vsyncpa [#allocation4], 0  ;;  %s582_s12 = smov [#allocation5]   ;;  %s583_s14 = smov [#allocation2]  }
   0x3   :  { %s34_s13 = sshll.u32 %s582_s12, 4  ;;  %s22_s15 = sshll.u32 %s583_s14, 4  ;;  %s35_s13 = int_to_ptr.vmem [resolvable:$true] %s34_s13  ;;  %s612_s15 = int_to_ptr.vmem [resolvable:$true] %s22_s15 }
   0x4   :  { %s488_s18 = scalar_lea.hbm %s689_s1, 128 }
   0x5   :  { %p489_p0 = scmp.ne.s32.totalorder %s689_s1, %s488_s18  ;;  %p492_p1 = scmp.lt.u32.totalorder %s488_s18, %s689_s1 }
   0x7   :  { %p494_p2 = pnand %p492_p1, %p489_p0 }
   0x9   :  { %497 = shalt.err (!%p494_p2)
}
   0xa   :  { %s498_s23 = scalar_lea.vmem %s35_s13, 128  ;;  %p503_p4 = scmp.lt.s32.totalorder %s35_s13, %s35_s13 }
   0xb   :  { %p499_p3 = scmp.ne.s32.totalorder %s35_s13, %s498_s23  ;;  %p504_p5 = scmp.lt.s32.totalorder %s498_s23, %s498_s23 }
   0xd   :  { %p505_p6 = por %p504_p5, %p503_p4 }
   0xf   :  { %p506_p7 = pnand %p505_p6, %p499_p3 }
  0x11   :  { %509 = shalt.err (!%p506_p7)
}
  0x12   :  { %s584_s24 = smov 64   ;;  %s585_s25 = smov 4  }
  0x13   :  { %40 = dma.hbm_to_vmem [thread:$0]  %s689_s1, 128, %s35_s13, [#allocation6], %s584_s24, %s584_s24, %s585_s25  }
  0x14   :  { %s510_s30 = scalar_lea.hbm %s688_s0, 128 }
  0x15   :  { %p511_p8 = scmp.ne.s32.totalorder %s688_s0, %s510_s30  ;;  %p514_p9 = scmp.lt.u32.totalorder %s510_s30, %s688_s0 }
  0x17   :  { %p516_p10 = pnand %p514_p9, %p511_p8 }
  0x19   :  { %519 = shalt.err (!%p516_p10)
}
  0x1a   :  { %s520_s8 = scalar_lea.vmem %s612_s15, 128  ;;  %p525_p12 = scmp.lt.s32.totalorder %s612_s15, %s612_s15 }
  0x1b   :  { %p521_p11 = scmp.ne.s32.totalorder %s612_s15, %s520_s8  ;;  %p526_p13 = scmp.lt.s32.totalorder %s520_s8, %s520_s8 }
  0x1d   :  { %p527_p0 = por %p526_p13, %p525_p12 }
  0x1f   :  { %p528_p1 = pnand %p527_p0, %p521_p11 }
  0x21   :  { %531 = shalt.err (!%p528_p1)
}
  0x22   :  { %28 = dma.hbm_to_vmem [thread:$0]  %s688_s0, 128, %s612_s15, [#allocation3], %s584_s24, %s584_s24, %s585_s25  }
  0x23   :  { %s586_s10 = smov [#allocation7]   ;;  %s532_s14 = scalar_lea.hbm %s690_s2, 512 }
  0x24   :  { %s46_s11 = sshll.u32 %s586_s10, 4  ;;  %p533_p2 = scmp.ne.s32.totalorder %s690_s2, %s532_s14  ;;  %s47_s11 = int_to_ptr.vmem [resolvable:$true] %s46_s11 }
  0x25   :  { %p536_p3 = scmp.lt.u32.totalorder %s532_s14, %s690_s2 }
  0x27   :  { %p538_p4 = pnand %p536_p3, %p533_p2 }
  0x29   :  { %541 = shalt.err (!%p538_p4)
}
  0x2a   :  { %s542_s20 = scalar_lea.vmem %s47_s11, 512  ;;  %p547_p6 = scmp.lt.s32.totalorder %s47_s11, %s47_s11 }
  0x2b   :  { %p543_p5 = scmp.ne.s32.totalorder %s47_s11, %s542_s20  ;;  %p548_p7 = scmp.lt.s32.totalorder %s542_s20, %s542_s20 }
  0x2d   :  { %p549_p8 = por %p548_p7, %p547_p6 }
  0x2f   :  { %p550_p9 = pnand %p549_p8, %p543_p5 }
  0x31   :  { %553 = shalt.err (!%p550_p9)
}
  0x32   :  { %52 = dma.hbm_to_vmem [thread:$0]  %s690_s2, 512, %s47_s11, [#allocation6], %s584_s24, %s584_s24, %s585_s25  }
  0x33   :  { %576 = dma.done.wait [#allocation3], 128  }
  0x34   :  { %577 = vsyncadd [#allocation3], 4294967168 }
  0x35   :  { %578 = dma.done.wait [#allocation6], 640  }
  0x36   :  { %579 = vsyncadd [#allocation6], 4294966656  ;;  %v587_v0 = vmov 0.0   ;;  %vm588_vm0 = vmmov 0   ;;  %v482_v1 = vld [vmem:[#allocation7] sm:$0xff]   ;;  %v483_v2 = vld [vmem:[#allocation2] sm:$0xff]  }
  0x37   :  { %438 = vmatprep.subr.bf16.mxu1 %v587_v0  ;;  %440 = vmatprep.mubr.msk.bf16.mxu1 %vm588_vm0, %v587_v0  ;;  %vm99_vm1 = vcmask 130048   ;;  %v484_v3 = vld [vmem:[#allocation7 + $0x8] sm:$0xff]   ;;  %v486_v4 = vld [vmem:[#allocation7 + $0x10] sm:$0xff]   ;;  %v485_v5 = vld [vmem:[#allocation7 + $0x18] sm:$0xff]   ;;  %s589_s2 = smov [#allocation8]  }
  0x38   :  { %450 = vmatprep.subr.bf16.mxu0 %v587_v0  ;;  %452 = vmatprep.mubr.msk.bf16.mxu0 %vm588_vm0, %v587_v0  ;;  %v487_v6 = vld [vmem:[#allocation5] sm:$0xff]   ;;  %s396_s21 = sshll.u32 %s589_s2, 4  ;;  %s397_s21 = int_to_ptr.vmem [resolvable:$true] %s396_s21 }
  0x39   :  { %439 = vmatpush3.bf16.msra.mxu1 %v482_v1  ;;  %451 = vmatpush3.bf16.msra.mxu0 %v486_v4  ;;  %s554_s22 = scalar_lea.vmem %s397_s21, 1024  ;;  %p559_p11 = scmp.lt.s32.totalorder %s397_s21, %s397_s21 }
  0x3a   :  { %444 = vmatprep.subr.bf16.mxu1 %v587_v0  ;;  %462 = vmatprep.subr.bf16.mxu0 %v487_v6  ;;  %p555_p10 = scmp.ne.s32.totalorder %s397_s21, %s554_s22  ;;  %p560_p12 = scmp.lt.s32.totalorder %s554_s22, %s554_s22 }
  0x3c   :  { %441 = vmatmul.mubr.msk.bf16.vlgmr.msra.gmra.mrb[0].mxu1 %vm99_vm1, %v483_v2  ;;  %453 = vmatmul.mubr.msk.bf16.vlgmr.msra.gmra.mrb[0].mxu0 %vm99_vm1, %v483_v2  ;;  %p561_p13 = por %p560_p12, %p559_p11 }
  0x3d   :  { %445 = vmatpush3.bf16.msra.mxu1 %v484_v3  ;;  %446 = vmatprep.mubr.msk.bf16.mxu1 %vm588_vm0, %v587_v0 }
  0x3e   :  { %456 = vmatprep.subr.bf16.mxu1 %v587_v0  ;;  %463 = vmatpush3.bf16.msra.mxu0 %v487_v6  ;;  %p562_p0 = pnand %p561_p13, %p555_p10 }
  0x44   :  { %447 = vmatmul.mubr.msk.bf16.vlgmr.msra.gmra.mrb[4].mxu1 %vm99_vm1, %v483_v2 }
  0x45   :  { %457 = vmatpush3.bf16.msra.mxu1 %v485_v5  ;;  %458 = vmatprep.mubr.msk.bf16.mxu1 %vm588_vm0, %v587_v0 }
  0x4c   :  { %459 = vmatmul.mubr.msk.bf16.vlgmr.msra.gmra.mrb[8].mxu1 %vm99_vm1, %v483_v2 }
 0x10f   :  { %v137_v7 = vpop.f32.mrb[0].mxu1  ;;  %v239_v12 = vpop.f32.mrb[0].mxu0 }
 0x110   :  { %v442_v8 = vpop.f32.mrb[1].mxu1  ;;  %v454_v13 = vpop.f32.mrb[1].mxu0 }
 0x111   :  { %v140_v9 = vpop.f32.mrb[2].mxu1  ;;  %v242_v14 = vpop.f32.mrb[2].mxu0 }
 0x112   :  { %v144_v10 = vpack.c.bf16 %v140_v9, %v137_v7  ;;  %v443_v11 = vpop.f32.mrb[3].mxu1  ;;  %v246_v16 = vpack.c.bf16 %v242_v14, %v239_v12  ;;  %v455_v17 = vpop.f32.mrb[3].mxu0 }
 0x114   :  { %464 = vmatprep.mubr.msk.bf16.mxu0 %vm99_vm1, %v144_v10 }
 0x117   :  { %v188_v15 = vpop.f32.mrb[4].mxu1 }
 0x118   :  { %v448_v18 = vpop.f32.mrb[5].mxu1 }
 0x119   :  { %v191_v19 = vpop.f32.mrb[6].mxu1 }
 0x11a   :  { %v195_v20 = vpack.c.bf16 %v191_v19, %v188_v15  ;;  %v449_v21 = vpop.f32.mrb[7].mxu1 }
 0x11c   :  { %465 = vmatmul.mubr.msk.bf16.vlgmr.msra.gmra.mrb[4].mxu0 %vm99_vm1, %v195_v20 }
 0x11d   :  { %468 = vmatprep.mubr.msk.bf16.mxu0 %vm99_vm1, %v246_v16 }
 0x11f   :  { %v290_v22 = vpop.f32.mrb[8].mxu1 }
 0x120   :  { %v460_v23 = vpop.f32.mrb[9].mxu1 }
 0x121   :  { %v293_v24 = vpop.f32.mrb[10].mxu1 }
 0x122   :  { %v297_v25 = vpack.c.bf16 %v293_v24, %v290_v22  ;;  %v461_v26 = vpop.f32.mrb[11].mxu1 }
 0x124   :  { %469 = vmatmul.mubr.msk.bf16.gmra.mrb[8].mxu0 %vm99_vm1, %v297_v25 }
 0x1ef   :  { %v466_v27 = vpop.f32.mrb[4].mxu0 }
 0x1f0   :  { %385 = vst [vmem:[#allocation8 + $0x10] sm:$0xff] %v466_v27  ;;  %v352_v28 = vpop.f32.mrb[5].mxu0 }
 0x1f1   :  { %383 = vst [vmem:[#allocation8] sm:$0xff] %v352_v28  ;;  %v467_v29 = vpop.f32.mrb[6].mxu0 }
 0x1f2   :  { %386 = vst [vmem:[#allocation8 + $0x18] sm:$0xff] %v467_v29  ;;  %v355_v30 = vpop.f32.mrb[7].mxu0 }
 0x1f3   :  { %384 = vst [vmem:[#allocation8 + $0x8] sm:$0xff] %v355_v30 }
 0x1f7   :  { %v470_v31 = vpop.f32.mrb[8].mxu0 }
 0x1f8   :  { %389 = vst [vmem:[#allocation8 + $0x30] sm:$0xff] %v470_v31  ;;  %v368_v32 = vpop.f32.mrb[9].mxu0 }
 0x1f9   :  { %387 = vst [vmem:[#allocation8 + $0x20] sm:$0xff] %v368_v32  ;;  %v471_v33 = vpop.f32.mrb[10].mxu0 }
 0x1fa   :  { %390 = vst [vmem:[#allocation8 + $0x38] sm:$0xff] %v471_v33  ;;  %v371_v34 = vpop.f32.mrb[11].mxu0 }
 0x1fb   :  { %388 = vst [vmem:[#allocation8 + $0x28] sm:$0xff] %v371_v34 }
 0x1fc   :  { %565 = shalt.err (!%p562_p0)
}
 0x1fd   :  { %s566_s25 = scalar_lea.hbm %s691_s3, 1024 }
 0x1fe   :  { %p567_p1 = scmp.ne.s32.totalorder %s691_s3, %s566_s25  ;;  %p570_p2 = scmp.lt.u32.totalorder %s566_s25, %s691_s3 }
 0x200   :  { %p572_p3 = pnand %p570_p2, %p567_p1 }
 0x202   :  { %575 = shalt.err (!%p572_p3)
}
 0x203   :  { %s590_s30 = smov 128   ;;  %s591_s4 = smov 8  }
 0x204   :  { %402 = dma.vmem_to_hbm [thread:$0]  %s397_s21, 1024, %s691_s3, [#allocation4], %s590_s30, %s590_s30, %s591_s4  }
 0x205   :  { %580 = dma.done.wait [#allocation4], 1024  }
 0x206   :  { %581 = vsyncadd [#allocation4], 4294966272 }
 0x207   :  { %406 = vsyncpa [#allocation3], 1 }
 0x208   :  { %407 = vsyncpa [#allocation6], 1 }
 0x209   :  { %408 = vsyncpa [#allocation4], 1 }

</bundles_post_ra>
